<compile_context>
chip_gen: v7x
topology: tpu7x:2x2x1
jax: 0.10.0
libtpu: 0.0.40
codegen_flags: <defaults>
</compile_context>

<pallas_src>
import math
import functools

import jax
import jax.numpy as jnp
from jax.experimental import pallas as pl
from jax.experimental.pallas import tpu as pltpu


def _mhsa_pool_kernel(x_ref, w_in_ref, b_in_ref, w_out_ref, b_out_ref, o_ref,
                      *, seq_len, embed_size, num_heads):
    E = embed_size
    H = num_heads
    Dh = E // H
    S = seq_len
    Bt = x_ref.shape[0]                     # batch tile (static block size)
    scale = 1.0 / math.sqrt(Dh)

    x = x_ref[...]                          # (Bt, S, E)  native dtype
    w_in = w_in_ref[...]                    # (E, 3E)     pre-transposed
    w_out = w_out_ref[...]                  # (E, E)      pre-transposed
    b_in = b_in_ref[...].astype(jnp.float32)    # (1, 3E)
    b_out = b_out_ref[...].astype(jnp.float32)  # (1, E)

    # Fused QKV projection for the whole batch tile: (Bt*S, E) @ (E, 3E).
    x2d = x.reshape(Bt * S, E)
    qkv = jnp.dot(x2d, w_in, preferred_element_type=jnp.float32) + b_in  # (Bt*S, 3E) f32
    qkv = qkv.reshape(Bt, S, 3 * E)

    q = qkv[:, :, 0 * E:1 * E] * scale      # fold 1/sqrt(Dh) into q once
    k = qkv[:, :, 1 * E:2 * E]
    v = qkv[:, :, 2 * E:3 * E]

    # Per-head attention, batched over the batch tile.  Pool (mean over the
    # query axis) before the P@V matmul — exactly equivalent and S× cheaper.
    head_pooled = []
    for h in range(H):
        q_h = q[:, :, h * Dh:(h + 1) * Dh]  # (Bt, S, Dh)
        k_h = k[:, :, h * Dh:(h + 1) * Dh]
        v_h = v[:, :, h * Dh:(h + 1) * Dh]
        s_h = jnp.einsum('bqd,bkd->bqk', q_h, k_h,
                         preferred_element_type=jnp.float32)       # (Bt, S, S)
        s_h = s_h - jnp.max(s_h, axis=-1, keepdims=True)
        p_h = jnp.exp(s_h)
        p_h = p_h * pl.reciprocal(jnp.sum(p_h, axis=-1, keepdims=True),
                                  approx=True)
        p_pool = jnp.mean(p_h, axis=1, keepdims=True)               # (Bt, 1, S)
        head_pooled.append(jnp.einsum('bqk,bkd->bqd', p_pool, v_h,
                                      preferred_element_type=jnp.float32))  # (Bt,1,Dh)

    pooled = jnp.concatenate(head_pooled, axis=-1).reshape(Bt, E)   # (Bt, E) f32

    # Output projection on the pooled rows only: (Bt, E) @ (E, E).
    out = jnp.dot(pooled.astype(w_out.dtype), w_out,
                  preferred_element_type=jnp.float32) + b_out       # (Bt, E)
    o_ref[...] = out.astype(o_ref.dtype)


def mhsa_with_pooling(x, in_proj_weight, in_proj_bias, out_proj_weight,
                      out_proj_bias, *, num_heads, block_batch=None):
    """x: (B, S, E) -> (B, 1, E)."""
    B, S, E = x.shape
    if block_batch is None:
        # Largest divisor of B that is <= 8 (fills f32 sublanes, always divides).
        block_batch = max(d for d in range(1, min(B, 8) + 1) if B % d == 0)
    assert B % block_batch == 0
    num_tiles = B // block_batch

    kernel = functools.partial(_mhsa_pool_kernel, seq_len=S, embed_size=E,
                               num_heads=num_heads)

    # One-time wrapper-side layout plumbing (free): transposed weights, 2D biases.
    w_in_t = in_proj_weight.T             # (E, 3E)
    w_out_t = out_proj_weight.T           # (E, E)
    b_in2 = in_proj_bias.reshape(1, 3 * E)
    b_out2 = out_proj_bias.reshape(1, E)

    out2d = pl.pallas_call(
        kernel,
        out_shape=jax.ShapeDtypeStruct((B, E), x.dtype),
        grid=(num_tiles,),
        in_specs=[
            pl.BlockSpec((block_batch, S, E), lambda b: (b, 0, 0)),  # x
            pl.BlockSpec((E, 3 * E), lambda b: (0, 0)),              # w_in^T (resident)
            pl.BlockSpec((1, 3 * E), lambda b: (0, 0)),              # b_in
            pl.BlockSpec((E, E), lambda b: (0, 0)),                  # w_out^T (resident)
            pl.BlockSpec((1, E), lambda b: (0, 0)),                  # b_out
        ],
        out_specs=pl.BlockSpec((block_batch, E), lambda b: (b, 0)),  # lane-dense 2D slab
        compiler_params=pltpu.CompilerParams(
            dimension_semantics=("parallel",)),                      # shard tiles on v7x
    )(x, w_in_t, b_in2, w_out_t, b_out2)

    return out2d.reshape(B, 1, E)


def _reference(x, w_in, b_in, w_out, b_out, num_heads):
    """Pure-JAX reference matching torch.nn.MultiheadAttention + mean pool."""
    B, S, E = x.shape
    H = num_heads
    Dh = E // H
    qkv = jnp.einsum("bse,fe->bsf", x, w_in) + b_in            # (B, S, 3E)
    q, k, v = jnp.split(qkv, 3, axis=-1)
    q = q.reshape(B, S, H, Dh).transpose(0, 2, 1, 3)
    k = k.reshape(B, S, H, Dh).transpose(0, 2, 1, 3)
    v = v.reshape(B, S, H, Dh).transpose(0, 2, 1, 3)
    scores = jnp.einsum("bhqd,bhkd->bhqk", q, k) / math.sqrt(Dh)
    p = jax.nn.softmax(scores, axis=-1)
    o = jnp.einsum("bhqk,bhkd->bhqd", p, v)
    o = o.transpose(0, 2, 1, 3).reshape(B, S, E)
    o = jnp.einsum("bse,fe->bsf", o, w_out) + b_out
    return jnp.mean(o, axis=1, keepdims=True)


if __name__ == "__main__":
    embed_size = 32
    num_heads = 4
    B, S = 2, 8

    key = jax.random.PRNGKey(0)
    kx, k1, k2, k3, k4 = jax.random.split(key, 5)

    x = jax.random.normal(kx, (B, S, embed_size), dtype=jnp.float32)
    # Deterministic synthetic parameters (same shapes as nn.MultiheadAttention).
    in_proj_weight = 0.05 * jax.random.normal(
        k1, (3 * embed_size, embed_size), dtype=jnp.float32)
    in_proj_bias = 0.05 * jax.random.normal(
        k2, (3 * embed_size,), dtype=jnp.float32)
    out_proj_weight = 0.05 * jax.random.normal(
        k3, (embed_size, embed_size), dtype=jnp.float32)
    out_proj_bias = 0.05 * jax.random.normal(
        k4, (embed_size,), dtype=jnp.float32)

    out = mhsa_with_pooling(x, in_proj_weight, in_proj_bias,
                            out_proj_weight, out_proj_bias,
                            num_heads=num_heads)
    out = jax.block_until_ready(out)

    ref = _reference(x, in_proj_weight, in_proj_bias,
                     out_proj_weight, out_proj_bias, num_heads)
    assert out.shape == (B, 1, embed_size)
    # Tolerance accounts for the EUP approximate-reciprocal softmax denominator.
    assert jnp.allclose(out, ref, atol=2e-3, rtol=2e-3)
    print("KERNEL_OK")
</pallas_src>

<mosaic_0001>
module attributes {stable_mosaic.version = 11 : i64} {
  func.func @_mhsa_pool_kernel(%arg0: i32, %arg1: memref<2x8x32xf32, #tpu.memory_space<vmem>>, %arg2: memref<32x96xf32, #tpu.memory_space<vmem>>, %arg3: memref<1x96xf32, #tpu.memory_space<vmem>>, %arg4: memref<32x32xf32, #tpu.memory_space<vmem>>, %arg5: memref<1x32xf32, #tpu.memory_space<vmem>>, %arg6: memref<2x32xf32, #tpu.memory_space<vmem>>) attributes {dimension_semantics = [#tpu.dimension_semantics<parallel>], iteration_bounds = array<i64: 1>, scalar_prefetch = 0 : i64, scratch_operands = 0 : i64, tpu.core_type = #tpu.core_type<tc>, window_params = [{transform_indices = @transform_0, window_bounds = array<i64: 2, 8, 32>}, {pipeline_mode = #tpu.pipeline_mode<synchronous>, transform_indices = @transform_1, window_bounds = array<i64: 32, 96>}, {pipeline_mode = #tpu.pipeline_mode<synchronous>, transform_indices = @transform_2, window_bounds = array<i64: 1, 96>}, {pipeline_mode = #tpu.pipeline_mode<synchronous>, transform_indices = @transform_3, window_bounds = array<i64: 32, 32>}, {pipeline_mode = #tpu.pipeline_mode<synchronous>, transform_indices = @transform_4, window_bounds = array<i64: 1, 32>}, {transform_indices = @transform_5, window_bounds = array<i64: 2, 32>}]} {
    %c0 = arith.constant 0 : index
    %c0_0 = arith.constant 0 : index
    %c0_1 = arith.constant 0 : index
    %0 = vector.load %arg1[%c0, %c0_0, %c0_1] : memref<2x8x32xf32, #tpu.memory_space<vmem>>, vector<2x8x32xf32>
    %c0_2 = arith.constant 0 : index
    %c0_3 = arith.constant 0 : index
    %1 = vector.load %arg2[%c0_2, %c0_3] : memref<32x96xf32, #tpu.memory_space<vmem>>, vector<32x96xf32>
    %c0_4 = arith.constant 0 : index
    %c0_5 = arith.constant 0 : index
    %2 = vector.load %arg4[%c0_4, %c0_5] : memref<32x32xf32, #tpu.memory_space<vmem>>, vector<32x32xf32>
    %c0_6 = arith.constant 0 : index
    %c0_7 = arith.constant 0 : index
    %3 = vector.load %arg3[%c0_6, %c0_7] : memref<1x96xf32, #tpu.memory_space<vmem>>, vector<1x96xf32>
    %c0_8 = arith.constant 0 : index
    %c0_9 = arith.constant 0 : index
    %4 = vector.load %arg5[%c0_8, %c0_9] : memref<1x32xf32, #tpu.memory_space<vmem>>, vector<1x32xf32>
    %5 = vector.shape_cast %0 : vector<2x8x32xf32> to vector<16x32xf32>
    %cst = arith.constant dense<0.000000e+00> : vector<16x96xf32>
    %6 = tpu.matmul %5, %1, %cst {dimension_numbers = #tpu.dot_dimension_numbers<[1], [0], [0], [1], [0, 0, 1, 1], [], []>} : vector<16x32xf32>, vector<32x96xf32>, vector<16x96xf32> -> vector<16x96xf32>
    %7 = vector.broadcast %3 : vector<1x96xf32> to vector<16x96xf32>
    %8 = arith.addf %6, %7 : vector<16x96xf32>
    %9 = vector.shape_cast %8 : vector<16x96xf32> to vector<2x8x96xf32>
    %10 = vector.extract_strided_slice %9 {offsets = [0, 0, 0], sizes = [2, 8, 32], strides = [1, 1, 1]} : vector<2x8x96xf32> to vector<2x8x32xf32>
    %cst_10 = arith.constant 0.353553385 : f32
    %11 = vector.broadcast %cst_10 : f32 to vector<2x8x32xf32>
    %12 = arith.mulf %10, %11 : vector<2x8x32xf32>
    %13 = vector.extract_strided_slice %9 {offsets = [0, 0, 32], sizes = [2, 8, 32], strides = [1, 1, 1]} : vector<2x8x96xf32> to vector<2x8x32xf32>
    %14 = vector.extract_strided_slice %9 {offsets = [0, 0, 64], sizes = [2, 8, 32], strides = [1, 1, 1]} : vector<2x8x96xf32> to vector<2x8x32xf32>
    %15 = vector.extract_strided_slice %12 {offsets = [0, 0, 0], sizes = [2, 8, 8], strides = [1, 1, 1]} : vector<2x8x32xf32> to vector<2x8x8xf32>
    %16 = vector.extract_strided_slice %13 {offsets = [0, 0, 0], sizes = [2, 8, 8], strides = [1, 1, 1]} : vector<2x8x32xf32> to vector<2x8x8xf32>
    %17 = vector.extract_strided_slice %14 {offsets = [0, 0, 0], sizes = [2, 8, 8], strides = [1, 1, 1]} : vector<2x8x32xf32> to vector<2x8x8xf32>
    "tpu.trace_start"() <{level = 10 : i32, message = "bqd,bkd->bqk"}> : () -> ()
    %cst_11 = arith.constant dense<0.000000e+00> : vector<2x8x8xf32>
    %18 = tpu.matmul %15, %16, %cst_11 {dimension_numbers = #tpu.dot_dimension_numbers<[2], [2], [1], [1], [0, 0, 0, 1, 1, 1], [0], [0]>} : vector<2x8x8xf32>, vector<2x8x8xf32>, vector<2x8x8xf32> -> vector<2x8x8xf32>
    "tpu.trace_stop"() : () -> ()
    %cst_12 = arith.constant dense<0xFF800000> : vector<2x8xf32>
    %19 = vector.multi_reduction <maximumf>, %18, %cst_12 [2] : vector<2x8x8xf32> to vector<2x8xf32>
    %20 = vector.shape_cast %19 : vector<2x8xf32> to vector<2x8x1xf32>
    %21 = vector.broadcast %20 : vector<2x8x1xf32> to vector<2x8x8xf32>
    %22 = arith.subf %18, %21 : vector<2x8x8xf32>
    %23 = math.exp %22 : vector<2x8x8xf32>
    %cst_13 = arith.constant dense<0.000000e+00> : vector<2x8xf32>
    %24 = vector.multi_reduction <add>, %23, %cst_13 [2] : vector<2x8x8xf32> to vector<2x8xf32>
    %25 = vector.shape_cast %24 : vector<2x8xf32> to vector<2x8x1xf32>
    %26 = tpu.reciprocal %25 {approx = true} : vector<2x8x1xf32> -> vector<2x8x1xf32>
    %27 = vector.broadcast %26 : vector<2x8x1xf32> to vector<2x8x8xf32>
    %28 = arith.mulf %23, %27 : vector<2x8x8xf32>
    %cst_14 = arith.constant dense<0.000000e+00> : vector<2x8xf32>
    %29 = vector.multi_reduction <add>, %28, %cst_14 [1] : vector<2x8x8xf32> to vector<2x8xf32>
    %30 = vector.shape_cast %29 : vector<2x8xf32> to vector<2x1x8xf32>
    %cst_15 = arith.constant 8.000000e+00 : f32
    %31 = vector.broadcast %cst_15 : f32 to vector<2x1x8xf32>
    %32 = arith.divf %30, %31 : vector<2x1x8xf32>
    "tpu.trace_start"() <{level = 10 : i32, message = "bqk,bkd->bqd"}> : () -> ()
    %cst_16 = arith.constant dense<0.000000e+00> : vector<2x1x8xf32>
    %33 = tpu.matmul %32, %17, %cst_16 {dimension_numbers = #tpu.dot_dimension_numbers<[2], [1], [1], [2], [0, 0, 0, 1, 1, 2], [0], [0]>} : vector<2x1x8xf32>, vector<2x8x8xf32>, vector<2x1x8xf32> -> vector<2x1x8xf32>
    "tpu.trace_stop"() : () -> ()
    %34 = vector.extract_strided_slice %12 {offsets = [0, 0, 8], sizes = [2, 8, 8], strides = [1, 1, 1]} : vector<2x8x32xf32> to vector<2x8x8xf32>
    %35 = vector.extract_strided_slice %13 {offsets = [0, 0, 8], sizes = [2, 8, 8], strides = [1, 1, 1]} : vector<2x8x32xf32> to vector<2x8x8xf32>
    %36 = vector.extract_strided_slice %14 {offsets = [0, 0, 8], sizes = [2, 8, 8], strides = [1, 1, 1]} : vector<2x8x32xf32> to vector<2x8x8xf32>
    "tpu.trace_start"() <{level = 10 : i32, message = "bqd,bkd->bqk"}> : () -> ()
    %cst_17 = arith.constant dense<0.000000e+00> : vector<2x8x8xf32>
    %37 = tpu.matmul %34, %35, %cst_17 {dimension_numbers = #tpu.dot_dimension_numbers<[2], [2], [1], [1], [0, 0, 0, 1, 1, 1], [0], [0]>} : vector<2x8x8xf32>, vector<2x8x8xf32>, vector<2x8x8xf32> -> vector<2x8x8xf32>
    "tpu.trace_stop"() : () -> ()
    %cst_18 = arith.constant dense<0xFF800000> : vector<2x8xf32>
    %38 = vector.multi_reduction <maximumf>, %37, %cst_18 [2] : vector<2x8x8xf32> to vector<2x8xf32>
    %39 = vector.shape_cast %38 : vector<2x8xf32> to vector<2x8x1xf32>
    %40 = vector.broadcast %39 : vector<2x8x1xf32> to vector<2x8x8xf32>
    %41 = arith.subf %37, %40 : vector<2x8x8xf32>
    %42 = math.exp %41 : vector<2x8x8xf32>
    %cst_19 = arith.constant dense<0.000000e+00> : vector<2x8xf32>
    %43 = vector.multi_reduction <add>, %42, %cst_19 [2] : vector<2x8x8xf32> to vector<2x8xf32>
    %44 = vector.shape_cast %43 : vector<2x8xf32> to vector<2x8x1xf32>
    %45 = tpu.reciprocal %44 {approx = true} : vector<2x8x1xf32> -> vector<2x8x1xf32>
    %46 = vector.broadcast %45 : vector<2x8x1xf32> to vector<2x8x8xf32>
    %47 = arith.mulf %42, %46 : vector<2x8x8xf32>
    %cst_20 = arith.constant dense<0.000000e+00> : vector<2x8xf32>
    %48 = vector.multi_reduction <add>, %47, %cst_20 [1] : vector<2x8x8xf32> to vector<2x8xf32>
    %49 = vector.shape_cast %48 : vector<2x8xf32> to vector<2x1x8xf32>
    %cst_21 = arith.constant 8.000000e+00 : f32
    %50 = vector.broadcast %cst_21 : f32 to vector<2x1x8xf32>
    %51 = arith.divf %49, %50 : vector<2x1x8xf32>
    "tpu.trace_start"() <{level = 10 : i32, message = "bqk,bkd->bqd"}> : () -> ()
    %cst_22 = arith.constant dense<0.000000e+00> : vector<2x1x8xf32>
    %52 = tpu.matmul %51, %36, %cst_22 {dimension_numbers = #tpu.dot_dimension_numbers<[2], [1], [1], [2], [0, 0, 0, 1, 1, 2], [0], [0]>} : vector<2x1x8xf32>, vector<2x8x8xf32>, vector<2x1x8xf32> -> vector<2x1x8xf32>
    "tpu.trace_stop"() : () -> ()
    %53 = vector.extract_strided_slice %12 {offsets = [0, 0, 16], sizes = [2, 8, 8], strides = [1, 1, 1]} : vector<2x8x32xf32> to vector<2x8x8xf32>
    %54 = vector.extract_strided_slice %13 {offsets = [0, 0, 16], sizes = [2, 8, 8], strides = [1, 1, 1]} : vector<2x8x32xf32> to vector<2x8x8xf32>
    %55 = vector.extract_strided_slice %14 {offsets = [0, 0, 16], sizes = [2, 8, 8], strides = [1, 1, 1]} : vector<2x8x32xf32> to vector<2x8x8xf32>
    "tpu.trace_start"() <{level = 10 : i32, message = "bqd,bkd->bqk"}> : () -> ()
    %cst_23 = arith.constant dense<0.000000e+00> : vector<2x8x8xf32>
    %56 = tpu.matmul %53, %54, %cst_23 {dimension_numbers = #tpu.dot_dimension_numbers<[2], [2], [1], [1], [0, 0, 0, 1, 1, 1], [0], [0]>} : vector<2x8x8xf32>, vector<2x8x8xf32>, vector<2x8x8xf32> -> vector<2x8x8xf32>
    "tpu.trace_stop"() : () -> ()
    %cst_24 = arith.constant dense<0xFF800000> : vector<2x8xf32>
    %57 = vector.multi_reduction <maximumf>, %56, %cst_24 [2] : vector<2x8x8xf32> to vector<2x8xf32>
    %58 = vector.shape_cast %57 : vector<2x8xf32> to vector<2x8x1xf32>
    %59 = vector.broadcast %58 : vector<2x8x1xf32> to vector<2x8x8xf32>
    %60 = arith.subf %56, %59 : vector<2x8x8xf32>
    %61 = math.exp %60 : vector<2x8x8xf32>
    %cst_25 = arith.constant dense<0.000000e+00> : vector<2x8xf32>
    %62 = vector.multi_reduction <add>, %61, %cst_25 [2] : vector<2x8x8xf32> to vector<2x8xf32>
    %63 = vector.shape_cast %62 : vector<2x8xf32> to vector<2x8x1xf32>
    %64 = tpu.reciprocal %63 {approx = true} : vector<2x8x1xf32> -> vector<2x8x1xf32>
    %65 = vector.broadcast %64 : vector<2x8x1xf32> to vector<2x8x8xf32>
    %66 = arith.mulf %61, %65 : vector<2x8x8xf32>
    %cst_26 = arith.constant dense<0.000000e+00> : vector<2x8xf32>
    %67 = vector.multi_reduction <add>, %66, %cst_26 [1] : vector<2x8x8xf32> to vector<2x8xf32>
    %68 = vector.shape_cast %67 : vector<2x8xf32> to vector<2x1x8xf32>
    %cst_27 = arith.constant 8.000000e+00 : f32
    %69 = vector.broadcast %cst_27 : f32 to vector<2x1x8xf32>
    %70 = arith.divf %68, %69 : vector<2x1x8xf32>
    "tpu.trace_start"() <{level = 10 : i32, message = "bqk,bkd->bqd"}> : () -> ()
    %cst_28 = arith.constant dense<0.000000e+00> : vector<2x1x8xf32>
    %71 = tpu.matmul %70, %55, %cst_28 {dimension_numbers = #tpu.dot_dimension_numbers<[2], [1], [1], [2], [0, 0, 0, 1, 1, 2], [0], [0]>} : vector<2x1x8xf32>, vector<2x8x8xf32>, vector<2x1x8xf32> -> vector<2x1x8xf32>
    "tpu.trace_stop"() : () -> ()
    %72 = vector.extract_strided_slice %12 {offsets = [0, 0, 24], sizes = [2, 8, 8], strides = [1, 1, 1]} : vector<2x8x32xf32> to vector<2x8x8xf32>
    %73 = vector.extract_strided_slice %13 {offsets = [0, 0, 24], sizes = [2, 8, 8], strides = [1, 1, 1]} : vector<2x8x32xf32> to vector<2x8x8xf32>
    %74 = vector.extract_strided_slice %14 {offsets = [0, 0, 24], sizes = [2, 8, 8], strides = [1, 1, 1]} : vector<2x8x32xf32> to vector<2x8x8xf32>
    "tpu.trace_start"() <{level = 10 : i32, message = "bqd,bkd->bqk"}> : () -> ()
    %cst_29 = arith.constant dense<0.000000e+00> : vector<2x8x8xf32>
    %75 = tpu.matmul %72, %73, %cst_29 {dimension_numbers = #tpu.dot_dimension_numbers<[2], [2], [1], [1], [0, 0, 0, 1, 1, 1], [0], [0]>} : vector<2x8x8xf32>, vector<2x8x8xf32>, vector<2x8x8xf32> -> vector<2x8x8xf32>
    "tpu.trace_stop"() : () -> ()
    %cst_30 = arith.constant dense<0xFF800000> : vector<2x8xf32>
    %76 = vector.multi_reduction <maximumf>, %75, %cst_30 [2] : vector<2x8x8xf32> to vector<2x8xf32>
    %77 = vector.shape_cast %76 : vector<2x8xf32> to vector<2x8x1xf32>
    %78 = vector.broadcast %77 : vector<2x8x1xf32> to vector<2x8x8xf32>
    %79 = arith.subf %75, %78 : vector<2x8x8xf32>
    %80 = math.exp %79 : vector<2x8x8xf32>
    %cst_31 = arith.constant dense<0.000000e+00> : vector<2x8xf32>
    %81 = vector.multi_reduction <add>, %80, %cst_31 [2] : vector<2x8x8xf32> to vector<2x8xf32>
    %82 = vector.shape_cast %81 : vector<2x8xf32> to vector<2x8x1xf32>
    %83 = tpu.reciprocal %82 {approx = true} : vector<2x8x1xf32> -> vector<2x8x1xf32>
    %84 = vector.broadcast %83 : vector<2x8x1xf32> to vector<2x8x8xf32>
    %85 = arith.mulf %80, %84 : vector<2x8x8xf32>
    %cst_32 = arith.constant dense<0.000000e+00> : vector<2x8xf32>
    %86 = vector.multi_reduction <add>, %85, %cst_32 [1] : vector<2x8x8xf32> to vector<2x8xf32>
    %87 = vector.shape_cast %86 : vector<2x8xf32> to vector<2x1x8xf32>
    %cst_33 = arith.constant 8.000000e+00 : f32
    %88 = vector.broadcast %cst_33 : f32 to vector<2x1x8xf32>
    %89 = arith.divf %87, %88 : vector<2x1x8xf32>
    "tpu.trace_start"() <{level = 10 : i32, message = "bqk,bkd->bqd"}> : () -> ()
    %cst_34 = arith.constant dense<0.000000e+00> : vector<2x1x8xf32>
    %90 = tpu.matmul %89, %74, %cst_34 {dimension_numbers = #tpu.dot_dimension_numbers<[2], [1], [1], [2], [0, 0, 0, 1, 1, 2], [0], [0]>} : vector<2x1x8xf32>, vector<2x8x8xf32>, vector<2x1x8xf32> -> vector<2x1x8xf32>
    "tpu.trace_stop"() : () -> ()
    %91 = tpu.concatenate %33, %52, %71, %90 in 2 : vector<2x1x8xf32>, vector<2x1x8xf32>, vector<2x1x8xf32>, vector<2x1x8xf32> -> vector<2x1x32xf32>
    %92 = vector.shape_cast %91 : vector<2x1x32xf32> to vector<2x32xf32>
    %cst_35 = arith.constant dense<0.000000e+00> : vector<2x32xf32>
    %93 = tpu.matmul %92, %2, %cst_35 {dimension_numbers = #tpu.dot_dimension_numbers<[1], [0], [0], [1], [0, 0, 1, 1], [], []>} : vector<2x32xf32>, vector<32x32xf32>, vector<2x32xf32> -> vector<2x32xf32>
    %94 = vector.broadcast %4 : vector<1x32xf32> to vector<2x32xf32>
    %95 = arith.addf %93, %94 : vector<2x32xf32>
    %c0_36 = arith.constant 0 : index
    %c0_37 = arith.constant 0 : index
    %96 = vector.load %arg6[%c0_36, %c0_37] : memref<2x32xf32, #tpu.memory_space<vmem>>, vector<2x32xf32>
    tpu.vector_store %arg6[%c0_36, %c0_37], %95 {strides = array<i32>} : memref<2x32xf32, #tpu.memory_space<vmem>>, vector<2x32xf32>,
    return
  }
  func.func @transform_0(%arg0: i32) -> (i32, i32, i32) {
    %c0_i32 = arith.constant 0 : i32
    %c0_i32_0 = arith.constant 0 : i32
    %c0_i32_1 = arith.constant 0 : i32
    return %arg0, %c0_i32, %c0_i32_0 : i32, i32, i32
  }
  func.func @transform_1(%arg0: i32) -> (i32, i32) {
    %c0_i32 = arith.constant 0 : i32
    %c0_i32_0 = arith.constant 0 : i32
    %c0_i32_1 = arith.constant 0 : i32
    return %c0_i32, %c0_i32_0 : i32, i32
  }
  func.func @transform_2(%arg0: i32) -> (i32, i32) {
    %c0_i32 = arith.constant 0 : i32
    %c0_i32_0 = arith.constant 0 : i32
    %c0_i32_1 = arith.constant 0 : i32
    return %c0_i32, %c0_i32_0 : i32, i32
  }
  func.func @transform_3(%arg0: i32) -> (i32, i32) {
    %c0_i32 = arith.constant 0 : i32
    %c0_i32_0 = arith.constant 0 : i32
    %c0_i32_1 = arith.constant 0 : i32
    return %c0_i32, %c0_i32_0 : i32, i32
  }
  func.func @transform_4(%arg0: i32) -> (i32, i32) {
    %c0_i32 = arith.constant 0 : i32
    %c0_i32_0 = arith.constant 0 : i32
    %c0_i32_1 = arith.constant 0 : i32
    return %c0_i32, %c0_i32_0 : i32, i32
  }
  func.func @transform_5(%arg0: i32) -> (i32, i32) {
    %c0_i32 = arith.constant 0 : i32
    %c0_i32_0 = arith.constant 0 : i32
    return %arg0, %c0_i32 : i32, i32
  }
}

</mosaic_0001>

<bundles_post_ra>
// kernel: tpu_custom_call.1
= control target key start
LH: loop header
LB: loop body
LE: loop exit
PB: predicated region body
PF: predicated region fallthrough
CT: control target
= control target key end

     0   :  { %10 = vsyncpa [#allocation3], 0  ;;  %s2292_s0 = inlined_call_operand.hbm [shape: f32[2,8,32], index: 0, kind: input, shape index: {}]   ;;  %s2293_s1 = inlined_call_operand.hbm [shape: f32[32,96], index: 1, kind: input, shape index: {}]   ;;  %s2294_s2 = inlined_call_operand.vmem [shape: f32[1,96], index: 2, kind: input, shape index: {}]   ;;  %s2295_s3 = inlined_call_operand.hbm [shape: f32[32,32], index: 3, kind: input, shape index: {}]   ;;  %s2296_s4 = inlined_call_operand.vmem [shape: f32[1,32], index: 4, kind: input, shape index: {}]   ;;  %s2297_s5 = inlined_call_operand.hbm [shape: f32[2,32], index: 5, kind: output, shape index: {}]  }
   0x1   :  { %11 = vsyncpa [#allocation6], 0 }
   0x2   :  { %12 = vsyncpa [#allocation4], 0  ;;  %s2019_s18 = smov [#allocation5]   ;;  %s2020_s20 = smov [#allocation2]  }
   0x3   :  { %s30_s19 = sshll.u32 %s2019_s18, 4  ;;  %s18_s21 = sshll.u32 %s2020_s20, 4  ;;  %s31_s19 = int_to_ptr.vmem [resolvable:$true] %s30_s19  ;;  %s2071_s21 = int_to_ptr.vmem [resolvable:$true] %s18_s21 }
   0x4   :  { %s1925_s24 = scalar_lea.hbm %s2293_s1, 512 }
   0x5   :  { %p1926_p0 = scmp.ne.s32.totalorder %s2293_s1, %s1925_s24  ;;  %p1929_p1 = scmp.lt.u32.totalorder %s1925_s24, %s2293_s1 }
   0x7   :  { %p1931_p2 = pnand %p1929_p1, %p1926_p0 }
   0x9   :  { %1934 = shalt.err (!%p1931_p2)
}
   0xa   :  { %s1935_s29 = scalar_lea.vmem %s31_s19, 512  ;;  %p1940_p4 = scmp.lt.s32.totalorder %s31_s19, %s31_s19 }
   0xb   :  { %p1936_p3 = scmp.ne.s32.totalorder %s31_s19, %s1935_s29  ;;  %p1941_p5 = scmp.lt.s32.totalorder %s1935_s29, %s1935_s29 }
   0xd   :  { %p1942_p6 = por %p1941_p5, %p1940_p4 }
   0xf   :  { %p1943_p7 = pnand %p1942_p6, %p1936_p3 }
  0x11   :  { %1946 = shalt.err (!%p1943_p7)
}
  0x12   :  { %s2021_s30 = smov 128   ;;  %s2022_s6 = smov 8  }
  0x13   :  { %36 = dma.hbm_to_vmem [thread:$0]  %s2293_s1, 512, %s31_s19, [#allocation6], %s2021_s30, %s2021_s30, %s2022_s6  }
  0x14   :  { %s1947_s11 = scalar_lea.hbm %s2292_s0, 256 }
  0x15   :  { %p1948_p8 = scmp.ne.s32.totalorder %s2292_s0, %s1947_s11  ;;  %p1951_p9 = scmp.lt.u32.totalorder %s1947_s11, %s2292_s0 }
  0x17   :  { %p1953_p10 = pnand %p1951_p9, %p1948_p8 }
  0x19   :  { %1956 = shalt.err (!%p1953_p10)
}
  0x1a   :  { %s1957_s16 = scalar_lea.vmem %s2071_s21, 256  ;;  %p1962_p12 = scmp.lt.s32.totalorder %s2071_s21, %s2071_s21 }
  0x1b   :  { %p1958_p11 = scmp.ne.s32.totalorder %s2071_s21, %s1957_s16  ;;  %p1963_p13 = scmp.lt.s32.totalorder %s1957_s16, %s1957_s16 }
  0x1d   :  { %p1964_p0 = por %p1963_p13, %p1962_p12 }
  0x1f   :  { %p1965_p1 = pnand %p1964_p0, %p1958_p11 }
  0x21   :  { %1968 = shalt.err (!%p1965_p1)
}
  0x22   :  { %24 = dma.hbm_to_vmem [thread:$0]  %s2292_s0, 256, %s2071_s21, [#allocation3], %s2021_s30, %s2021_s30, %s2022_s6  }
  0x23   :  { %s2023_s18 = smov [#allocation7]   ;;  %s1969_s23 = scalar_lea.hbm %s2295_s3, 512 }
  0x24   :  { %s44_s19 = sshll.u32 %s2023_s18, 4  ;;  %p1970_p2 = scmp.ne.s32.totalorder %s2295_s3, %s1969_s23  ;;  %s45_s19 = int_to_ptr.vmem [resolvable:$true] %s44_s19 }
  0x25   :  { %p1973_p3 = scmp.lt.u32.totalorder %s1969_s23, %s2295_s3 }
  0x27   :  { %p1975_p4 = pnand %p1973_p3, %p1970_p2 }
  0x29   :  { %1978 = shalt.err (!%p1975_p4)
}
  0x2a   :  { %s1979_s28 = scalar_lea.vmem %s45_s19, 512  ;;  %p1984_p6 = scmp.lt.s32.totalorder %s45_s19, %s45_s19 }
  0x2b   :  { %p1980_p5 = scmp.ne.s32.totalorder %s45_s19, %s1979_s28  ;;  %p1985_p7 = scmp.lt.s32.totalorder %s1979_s28, %s1979_s28 }
  0x2d   :  { %p1986_p8 = por %p1985_p7, %p1984_p6 }
  0x2f   :  { %p1987_p9 = pnand %p1986_p8, %p1980_p5 }
  0x31   :  { %1990 = shalt.err (!%p1987_p9)
}
  0x32   :  { %50 = dma.hbm_to_vmem [thread:$0]  %s2295_s3, 512, %s45_s19, [#allocation6], %s2021_s30, %s2021_s30, %s2022_s6  }
  0x33   :  { %2013 = dma.done.wait [#allocation3], 256  }
  0x34   :  { %2014 = vsyncadd [#allocation3], 4294967040 }
  0x35   :  { %2015 = dma.done.wait [#allocation6], 1024  }
  0x36   :  { %2016 = vsyncadd [#allocation6], 4294966272  ;;  %vm80_vm0 = vcmask 261120   ;;  %v64_v0 = vld [vmem:[#allocation5] sm:$0xff]  ;;  %v65_v1 = vld [vmem:[#allocation5 + $0x8] sm:$0xff]  ;;  %v2024_v8 = vmov 0.0  }
  0x37   :  { %v66_v2 = vld [vmem:[#allocation5 + $0x10] sm:$0xff]  ;;  %v1857_v3 = vpack.c.bf16 %v65_v1, %v64_v0  ;;  %v67_v4 = vld [vmem:[#allocation5 + $0x18] sm:$0xff]  ;;  %1766 = vmatprep.subr.mxu1 %v2024_v8  ;;  %vm2025_vm1 = vmmov 0   ;;  %s2026_s30 = smov 96   ;;  %vm167_vm2 = vcmask 64512   ;;  %s2028_s7 = smov 120  }
  0x38   :  { %v62_v5 = vld [vmem:[#allocation2] sm:$0xff]  ;;  %v1861_v6 = vpack.c.bf16 %v67_v4, %v66_v2  ;;  %v63_v7 = vld [vmem:[#allocation2 + $0x8] sm:$0xff]  ;;  %1768 = vmatprep.mubr.msk.f32.mxu1 %vm2025_vm1, %v2024_v8  ;;  %s2029_s8 = smov 88   ;;  %s2030_s9 = smov 56   ;;  %vm1576_vm3 = vcmask 130048   ;;  %vm1579_vm4 = vcmask 195584  }
  0x39   :  { %1763 = vmatprep.mubr.msk.f32.mxu0 %vm80_vm0, %v62_v5  ;;  %1858 = vmatprep.subr.bf16.mxu0 %v1857_v3  ;;  %v1683_v9 = vld [vmem:[%s2294_s2] ss:$0 sm:$0xff]  ;;  %s2027_s2 = smov 64   ;;  %s2031_s10 = smov 112   ;;  %vm1591_vm5 = vcmask 1041409   ;;  %vm1665_vm6 = vcmask 254976  }
  0x3a   :  { %1860 = vmatpush3.bf16.msra.mxu0 %v1857_v3  ;;  %s2032_s11 = smov 80   ;;  %s2033_s12 = smov 48  }
  0x3b   :  { %1862 = vmatprep.subr.bf16.mxu0 %v1861_v6  ;;  %s2034_s13 = smov 72   ;;  %s2035_s14 = smov 104  }
  0x3c   :  { %s2036_s15 = smov 40   ;;  %s2037_s16 = smov 16  }
  0x3d   :  { %s2040_s18 = smov [#allocation8]  }
  0x3e   :  { %1864 = vmatpush3.bf16.msra.mxu0 %v1861_v6  ;;  %s1673_s19 = sshll.u32 %s2040_s18, 4  ;;  %s1674_s19 = int_to_ptr.vmem [resolvable:$true] %s1673_s19 }
  0x3f   :  { %1786 = vmatprep.subr.mxu0 %v2024_v8  ;;  %s1991_s20 = scalar_lea.vmem %s1674_s19, 32  ;;  %p1996_p11 = scmp.lt.s32.totalorder %s1674_s19, %s1674_s19 }
  0x40   :  { %p1992_p10 = scmp.ne.s32.totalorder %s1674_s19, %s1991_s20  ;;  %p1997_p12 = scmp.lt.s32.totalorder %s1991_s20, %s1991_s20 }
  0x41   :  { %1764 = vmatmul.mubr.msk.f32.vlgmr.msra.gmra.mrb[0].mxu0 %vm80_vm0, %v63_v7 }
  0x42   :  { %1788 = vmatprep.mubr.msk.f32.mxu0 %vm2025_vm1, %v2024_v8  ;;  %p1998_p13 = por %p1997_p12, %p1996_p11 }
  0x44   :  { %p1999_p0 = pnand %p1998_p13, %p1992_p10 }
 0x114   :  { %v1765_v10 = vpop.f32.mrb[0].mxu0 }
 0x115   :  { %v153_v11 = vpop.f32.mrb[1].mxu0  ;;  %v2137_v13 = vadd.f32 %v1765_v10, %v1683_v9 }
 0x116   :  { %v2134_v12 = vadd.f32 %v1683_v9, %v153_v11 }
 0x117   :  { %v2151_v17 = vmul.f32 0.35355338, %v2137_v13 }
 0x118   :  { %165 = vrot.lane.b32.xlu0 %v2134_v12, %s2026_s30  ;;  %v2143_v15 = vmul.f32 0.35355338, %v2134_v12 }
 0x11c   :  { %244 = vrot.lane.b32.xlu0 %v2137_v13, %s2026_s30 }
 0x18a   :  { %v166_v14 = vpop.permute.xlu0 %165 }
 0x18b   :  { %1767 = vmatpush3.xpose.msk.msra.mxu1 %vm167_vm2, %v166_v14 }
 0x18c   :  { %1771 = vmatprep.subr.mxu1 %v2024_v8 }
 0x18e   :  { %v245_v16 = vpop.permute.xlu0 %244  ;;  %1769 = vmatmul.mubr.msk.f32.vlgmr.msra.gmra.mrb[0].mxu1 %vm167_vm2, %v2143_v15 }
 0x18f   :  { %1772 = vmatpush3.xpose.msk.msra.mxu1 %vm167_vm2, %v245_v16  ;;  %1773 = vmatprep.mubr.msk.f32.mxu1 %vm2025_vm1, %v2024_v8 }
 0x190   :  { %1776 = vmatprep.subr.mxu1 %v2024_v8 }
 0x192   :  { %1774 = vmatmul.mubr.msk.f32.vlgmr.msra.gmra.mrb[2].mxu1 %vm167_vm2, %v2151_v17 }
 0x193   :  { %1778 = vmatprep.mubr.msk.f32.mxu1 %vm2025_vm1, %v2024_v8 }
 0x261   :  { %v239_v18 = vpop.f32.mrb[0].mxu1 }
 0x262   :  { %v1770_v19 = vpop.f32.mrb[1].mxu1  ;;  %v321_v20 = vsel %vm167_vm2, %v239_v18, -inf }
 0x263   :  { %322 = vmax.xlane.f32.xlu1 %v321_v20 }
 0x265   :  { %v317_v21 = vpop.f32.mrb[2].mxu1 }
 0x266   :  { %v1775_v22 = vpop.f32.mrb[3].mxu1  ;;  %v324_v23 = vsel %vm167_vm2, %v317_v21, -inf }
 0x267   :  { %325 = vmax.xlane.f32.xlu1 %v324_v23 }
 0x278   :  { %360 = vrot.lane.b32.xlu1 %v2134_v12, %s2027_s2 }
 0x2f0   :  { %v323_v24 = vpop.xlane.xlu1 %322 }
 0x2f1   :  { %v327_v25 = vsub.f32 %v239_v18, %v323_v24 }
 0x2f3   :  { %v329_v26 = vmul.f32 1.442695, %v327_v25 }
 0x2f4   :  { %v326_v27 = vpop.xlane.xlu1 %325 }
 0x2f5   :  { %1893 = vpow2.f32 %v329_v26  ;;  %v328_v28 = vsub.f32 %v317_v21, %v326_v27 }
 0x2f7   :  { %v331_v29 = vmul.f32 1.442695, %v328_v28 }
 0x2f8   :  { %v361_v30 = vpop.permute.xlu1 %360 }
 0x2f9   :  { %1895 = vpow2.f32 %v331_v29  ;;  %1777 = vmatpush3.msra.mxu1 %v361_v30 }
 0x2fa   :  { %1781 = vmatprep.subr.mxu1 %v2024_v8 }
 0x2ff   :  { %v1894_v31 = vpop.eup %1893 }
 0x300   :  { %v333_v32 = vsel %vm167_vm2, %v1894_v31, 0.0 }
 0x301   :  { %334 = vadd.xlane.f32.xlu0 %v333_v32 }
 0x303   :  { %v1896_v33 = vpop.eup %1895 }
 0x304   :  { %v336_v34 = vsel %vm167_vm2, %v1896_v33, 0.0 }
 0x305   :  { %337 = vadd.xlane.f32.xlu1 %v336_v34 }
 0x316   :  { %436 = vrot.lane.b32.xlu1 %v2137_v13, %s2027_s2 }
 0x317   :  { %590 = vrot.lane.b32.xlu0 %v2151_v17, %s2028_s7 }
 0x31a   :  { %592 = vrot.lane.b32.xlu1 %v2137_v13, %s2029_s8 }
 0x31e   :  { %514 = vrot.lane.b32.xlu1 %v2134_v12, %s2029_s8 }
 0x322   :  { %512 = vrot.lane.b32.xlu1 %v2143_v15, %s2028_s7 }
 0x38e   :  { %v335_v35 = vpop.xlane.xlu0 %334 }
 0x38f   :  { %1897 = vrcp.f32 %v335_v35 }
 0x392   :  { %v338_v36 = vpop.xlane.xlu1 %337  ;;  %v591_v61 = vpop.permute.xlu0 %590 }
 0x393   :  { %1899 = vrcp.f32 %v338_v36 }
 0x396   :  { %v437_v37 = vpop.permute.xlu1 %436 }
 0x399   :  { %v1898_v38 = vpop.eup %1897 }
 0x39a   :  { %v341_v39 = vmul.f32 %v1898_v38, %v1894_v31  ;;  %v593_v40 = vpop.permute.xlu1 %592 }
 0x39c   :  { %v343_v41 = vsel %vm167_vm2, %v341_v39, 0.0 }
 0x39d   :  { %v1900_v42 = vpop.eup %1899  ;;  %v344_v43 = vrot.slane %v343_v41, 4 }
 0x39e   :  { %v342_v44 = vmul.f32 %v1900_v42, %v1896_v33  ;;  %v515_v45 = vpop.permute.xlu1 %514 }
 0x39f   :  { %v345_v46 = vadd.f32 %v344_v43, %v343_v41  ;;  %1787 = vmatpush3.xpose.msk.msra.mxu0 %vm167_vm2, %v515_v45 }
 0x3a0   :  { %v350_v47 = vsel %vm167_vm2, %v342_v44, 0.0  ;;  %1796 = vmatprep.subr.mxu0 %v2024_v8 }
 0x3a1   :  { %v351_v48 = vrot.slane %v350_v47, 4  ;;  %v346_v49 = vrot.slane %v345_v46, 2 }
 0x3a2   :  { %v513_v50 = vpop.permute.xlu1 %512 }
 0x3a3   :  { %v352_v51 = vadd.f32 %v351_v48, %v350_v47  ;;  %1789 = vmatmul.mubr.msk.f32.vlgmr.msra.gmra.mrb[2].mxu0 %vm167_vm2, %v513_v50  ;;  %v347_v52 = vadd.f32 %v346_v49, %v345_v46 }
 0x3a4   :  { %1798 = vmatprep.mubr.msk.f32.mxu0 %vm2025_vm1, %v2024_v8 }
 0x3a5   :  { %v348_v53 = vrot.slane %v347_v52, 1  ;;  %v353_v54 = vrot.slane %v352_v51, 2 }
 0x3a7   :  { %v349_v55 = vadd.f32 %v348_v53, %v347_v52  ;;  %v354_v56 = vadd.f32 %v353_v54, %v352_v51 }
 0x3a9   :  { %v358_v57 = vmul.f32 0.125, %v349_v55  ;;  %v355_v58 = vrot.slane %v354_v56, 1 }
 0x3ab   :  { %1779 = vmatmul.mubr.msk.f32.vlgmr.msra.gmra.mrb[4].mxu1 %vm167_vm2, %v358_v57  ;;  %v356_v59 = vadd.f32 %v355_v58, %v354_v56 }
 0x3ac   :  { %1782 = vmatpush3.msra.mxu1 %v437_v37  ;;  %1783 = vmatprep.mubr.msk.f32.mxu1 %vm2025_vm1, %v2024_v8 }
 0x3ad   :  { %v359_v60 = vmul.f32 0.125, %v356_v59  ;;  %1791 = vmatprep.subr.mxu1 %v2024_v8 }
 0x3af   :  { %1784 = vmatmul.mubr.msk.f32.vlgmr.msra.gmra.mrb[6].mxu1 %vm167_vm2, %v359_v60 }
 0x3b0   :  { %1793 = vmatprep.mubr.msk.f32.mxu1 %vm2025_vm1, %v2024_v8 }
 0x3b3   :  { %1792 = vmatpush3.xpose.msk.msra.mxu1 %vm167_vm2, %v593_v40 }
 0x3b4   :  { %1801 = vmatprep.subr.mxu1 %v2024_v8 }
 0x3b6   :  { %1794 = vmatmul.mubr.msk.f32.vlgmr.msra.gmra.mrb[8].mxu1 %vm167_vm2, %v591_v61 }
 0x3b7   :  { %1803 = vmatprep.mubr.msk.f32.mxu1 %vm2025_vm1, %v2024_v8 }
 0x476   :  { %v586_v62 = vpop.f32.mrb[2].mxu0 }
 0x477   :  { %v1790_v63 = vpop.f32.mrb[3].mxu0  ;;  %v668_v0 = vsel %vm167_vm2, %v586_v62, -inf }
 0x478   :  { %669 = vmax.xlane.f32.xlu0 %v668_v0 }
 0x47e   :  { %v2189_v1 = vpop.f32.mrb[4].mxu1 }
 0x47f   :  { %v1780_v2 = vpop.f32.mrb[5].mxu1 }
 0x482   :  { %v2191_v3 = vpop.f32.mrb[6].mxu1 }
 0x483   :  { %v1785_v4 = vpop.f32.mrb[7].mxu1 }
 0x489   :  { %v664_v5 = vpop.f32.mrb[8].mxu1 }
 0x48a   :  { %v1795_v6 = vpop.f32.mrb[9].mxu1  ;;  %v671_v7 = vsel %vm167_vm2, %v664_v5, -inf }
 0x48b   :  { %672 = vmax.xlane.f32.xlu1 %v671_v7 }
 0x48e   :  { %706 = vrot.lane.b32.xlu0 %v2134_v12, %s2030_s9 }
 0x492   :  { %936 = vrot.lane.b32.xlu0 %v2151_v17, %s2031_s10 }
 0x505   :  { %v670_v9 = vpop.xlane.xlu0 %669 }
 0x506   :  { %v674_v10 = vsub.f32 %v586_v62, %v670_v9 }
 0x508   :  { %v676_v11 = vmul.f32 1.442695, %v674_v10 }
 0x509   :  { %v707_v14 = vpop.permute.xlu0 %706 }
 0x50a   :  { %1901 = vpow2.f32 %v676_v11  ;;  %1797 = vmatpush3.msra.mxu0 %v707_v14 }
 0x50b   :  { %1806 = vmatprep.subr.mxu0 %v2024_v8 }
 0x50d   :  { %v937_v50 = vpop.permute.xlu0 %936 }
 0x514   :  { %v1902_v16 = vpop.eup %1901 }
 0x515   :  { %v680_v18 = vsel %vm167_vm2, %v1902_v16, 0.0 }
 0x516   :  { %681 = vadd.xlane.f32.xlu1 %v680_v18 }
 0x518   :  { %v673_v19 = vpop.xlane.xlu1 %672 }
 0x519   :  { %v675_v20 = vsub.f32 %v664_v5, %v673_v19 }
 0x51b   :  { %v678_v21 = vmul.f32 1.442695, %v675_v20 }
 0x51d   :  { %1903 = vpow2.f32 %v678_v21 }
 0x527   :  { %v1904_v22 = vpop.eup %1903 }
 0x528   :  { %v683_v23 = vsel %vm167_vm2, %v1904_v22, 0.0 }
 0x529   :  { %684 = vadd.xlane.f32.xlu1 %v683_v23 }
 0x53a   :  { %782 = vrot.lane.b32.xlu1 %v2137_v13, %s2030_s9 }
 0x53e   :  { %938 = vrot.lane.b32.xlu1 %v2137_v13, %s2032_s11 }
 0x542   :  { %860 = vrot.lane.b32.xlu1 %v2134_v12, %s2032_s11 }
 0x546   :  { %858 = vrot.lane.b32.xlu1 %v2143_v15, %s2031_s10 }
 0x5a3   :  { %v682_v24 = vpop.xlane.xlu1 %681 }
 0x5a4   :  { %1905 = vrcp.f32 %v682_v24 }
 0x5ae   :  { %v1906_v25 = vpop.eup %1905 }
 0x5af   :  { %v688_v26 = vmul.f32 %v1906_v25, %v1902_v16 }
 0x5b1   :  { %v690_v27 = vsel %vm167_vm2, %v688_v26, 0.0 }
 0x5b2   :  { %v691_v28 = vrot.slane %v690_v27, 4 }
 0x5b4   :  { %v692_v29 = vadd.f32 %v691_v28, %v690_v27 }
 0x5b6   :  { %v685_v30 = vpop.xlane.xlu1 %684  ;;  %v693_v31 = vrot.slane %v692_v29, 2 }
 0x5b7   :  { %1907 = vrcp.f32 %v685_v30 }
 0x5b8   :  { %v694_v32 = vadd.f32 %v693_v31, %v692_v29 }
 0x5ba   :  { %v783_v33 = vpop.permute.xlu1 %782  ;;  %v695_v34 = vrot.slane %v694_v32, 1 }
 0x5bb   :  { %1802 = vmatpush3.msra.mxu1 %v783_v33 }
 0x5bc   :  { %v696_v35 = vadd.f32 %v695_v34, %v694_v32  ;;  %1811 = vmatprep.subr.mxu1 %v2024_v8 }
 0x5be   :  { %v939_v36 = vpop.permute.xlu1 %938  ;;  %v704_v37 = vmul.f32 0.125, %v696_v35 }
 0x5c0   :  { %1799 = vmatmul.mubr.msk.f32.vlgmr.msra.gmra.mrb[4].mxu0 %vm167_vm2, %v704_v37 }
 0x5c1   :  { %v1908_v38 = vpop.eup %1907  ;;  %1808 = vmatprep.mubr.msk.f32.mxu0 %vm2025_vm1, %v2024_v8 }
 0x5c2   :  { %v689_v39 = vmul.f32 %v1908_v38, %v1904_v22  ;;  %v861_v40 = vpop.permute.xlu1 %860 }
 0x5c3   :  { %1807 = vmatpush3.xpose.msk.msra.mxu0 %vm167_vm2, %v861_v40 }
 0x5c4   :  { %v697_v41 = vsel %vm167_vm2, %v689_v39, 0.0  ;;  %1816 = vmatprep.subr.mxu0 %v2024_v8 }
 0x5c5   :  { %v698_v42 = vrot.slane %v697_v41, 4 }
 0x5c6   :  { %v859_v43 = vpop.permute.xlu1 %858 }
 0x5c7   :  { %v699_v44 = vadd.f32 %v698_v42, %v697_v41  ;;  %1809 = vmatmul.mubr.msk.f32.vlgmr.msra.gmra.mrb[6].mxu0 %vm167_vm2, %v859_v43 }
 0x5c8   :  { %1818 = vmatprep.mubr.msk.f32.mxu0 %vm2025_vm1, %v2024_v8 }
 0x5c9   :  { %v700_v45 = vrot.slane %v699_v44, 2 }
 0x5cb   :  { %v701_v46 = vadd.f32 %v700_v45, %v699_v44 }
 0x5cd   :  { %v702_v47 = vrot.slane %v701_v46, 1 }
 0x5cf   :  { %v703_v48 = vadd.f32 %v702_v47, %v701_v46 }
 0x5d1   :  { %v705_v49 = vmul.f32 0.125, %v703_v48 }
 0x5d3   :  { %1804 = vmatmul.mubr.msk.f32.vlgmr.msra.gmra.mrb[10].mxu1 %vm167_vm2, %v705_v49 }
 0x5d4   :  { %1812 = vmatpush3.xpose.msk.msra.mxu1 %vm167_vm2, %v939_v36  ;;  %1813 = vmatprep.mubr.msk.f32.mxu1 %vm2025_vm1, %v2024_v8 }
 0x5d5   :  { %1821 = vmatprep.subr.mxu1 %v2024_v8 }
 0x5d7   :  { %1814 = vmatmul.mubr.msk.f32.vlgmr.msra.gmra.mrb[12].mxu1 %vm167_vm2, %v937_v50 }
 0x5d8   :  { %1823 = vmatprep.mubr.msk.f32.mxu1 %vm2025_vm1, %v2024_v8 }
 0x693   :  { %v2222_v51 = vpop.f32.mrb[4].mxu0 }
 0x694   :  { %v1800_v52 = vpop.f32.mrb[5].mxu0 }
 0x69a   :  { %v932_v53 = vpop.f32.mrb[6].mxu0 }
 0x69b   :  { %v1810_v54 = vpop.f32.mrb[7].mxu0  ;;  %v1014_v55 = vsel %vm167_vm2, %v932_v53, -inf }
 0x69c   :  { %1015 = vmax.xlane.f32.xlu1 %v1014_v55 }
 0x6a6   :  { %v2225_v56 = vpop.f32.mrb[10].mxu1 }
 0x6a7   :  { %v1805_v57 = vpop.f32.mrb[11].mxu1 }
 0x6aa   :  { %v1010_v58 = vpop.f32.mrb[12].mxu1 }
 0x6ab   :  { %v1815_v59 = vpop.f32.mrb[13].mxu1  ;;  %v1017_v60 = vsel %vm167_vm2, %v1010_v58, -inf }
 0x6ac   :  { %1018 = vmax.xlane.f32.xlu0 %v1017_v60 }
 0x6ad   :  { %1128 = vrot.lane.b32.xlu1 %v2137_v13, %s2033_s12 }
 0x6b1   :  { %1284 = vrot.lane.b32.xlu1 %v2137_v13, %s2034_s13 }
 0x6b5   :  { %1206 = vrot.lane.b32.xlu1 %v2134_v12, %s2034_s13 }
 0x6b9   :  { %1204 = vrot.lane.b32.xlu1 %v2143_v15, %s2035_s14 }
 0x729   :  { %v1016_v61 = vpop.xlane.xlu1 %1015 }
 0x72a   :  { %v1020_v63 = vsub.f32 %v932_v53, %v1016_v61 }
 0x72c   :  { %v1022_v4 = vmul.f32 1.442695, %v1020_v63 }
 0x72d   :  { %v1129_v62 = vpop.permute.xlu1 %1128 }
 0x72e   :  { %1822 = vmatpush3.msra.mxu1 %v1129_v62 }
 0x72f   :  { %1831 = vmatprep.subr.mxu1 %v2024_v8 }
 0x731   :  { %v1285_v30 = vpop.permute.xlu1 %1284 }
 0x735   :  { %v1207_v36 = vpop.permute.xlu1 %1206 }
 0x739   :  { %v1019_v0 = vpop.xlane.xlu0 %1018  ;;  %v1205_v39 = vpop.permute.xlu1 %1204 }
 0x73a   :  { %v1021_v2 = vsub.f32 %v1010_v58, %v1019_v0 }
 0x73c   :  { %v1024_v5 = vmul.f32 1.442695, %v1021_v2 }
 0x73e   :  { %1909 = vpow2.f32 %v1024_v5 }
 0x73f   :  { %1911 = vpow2.f32 %v1022_v4 }
 0x748   :  { %v1910_v6 = vpop.eup %1909 }
 0x749   :  { %v1029_v7 = vsel %vm167_vm2, %v1910_v6, 0.0  ;;  %v1912_v9 = vpop.eup %1911 }
 0x74a   :  { %1030 = vadd.xlane.f32.xlu0 %v1029_v7  ;;  %v1026_v10 = vsel %vm167_vm2, %v1912_v9, 0.0 }
 0x74e   :  { %1027 = vadd.xlane.f32.xlu0 %v1026_v10 }
 0x764   :  { %1052 = vrot.lane.b32.xlu0 %v2134_v12, %s2033_s12 }
 0x768   :  { %1282 = vrot.lane.b32.xlu0 %v2151_v17, %s2035_s14 }
 0x7d7   :  { %v1031_v15 = vpop.xlane.xlu0 %1030 }
 0x7d8   :  { %1913 = vrcp.f32 %v1031_v15 }
 0x7db   :  { %v1028_v11 = vpop.xlane.xlu0 %1027 }
 0x7dc   :  { %1915 = vrcp.f32 %v1028_v11 }
 0x7df   :  { %v1053_v14 = vpop.permute.xlu0 %1052 }
 0x7e0   :  { %1817 = vmatpush3.msra.mxu0 %v1053_v14 }
 0x7e1   :  { %1826 = vmatprep.subr.mxu0 %v2024_v8 }
 0x7e2   :  { %v1914_v16 = vpop.eup %1913 }
 0x7e3   :  { %v1035_v18 = vmul.f32 %v1914_v16, %v1910_v6  ;;  %v1283_v38 = vpop.permute.xlu0 %1282 }
 0x7e5   :  { %v1043_v19 = vsel %vm167_vm2, %v1035_v18, 0.0 }
 0x7e6   :  { %v1916_v20 = vpop.eup %1915  ;;  %v1044_v21 = vrot.slane %v1043_v19, 4 }
 0x7e7   :  { %v1034_v22 = vmul.f32 %v1916_v20, %v1912_v9 }
 0x7e8   :  { %v1045_v23 = vadd.f32 %v1044_v21, %v1043_v19 }
 0x7e9   :  { %v1036_v24 = vsel %vm167_vm2, %v1034_v22, 0.0 }
 0x7ea   :  { %v1037_v25 = vrot.slane %v1036_v24, 4  ;;  %v1046_v17 = vrot.slane %v1045_v23, 2 }
 0x7ec   :  { %v1038_v26 = vadd.f32 %v1037_v25, %v1036_v24  ;;  %v1047_v27 = vadd.f32 %v1046_v17, %v1045_v23  ;;  %v68_v24 = vld [vmem:[#allocation7] sm:$0xff]  ;;  %v69_v25 = vld [vmem:[#allocation7 + $0x8] sm:$0xff]  ;;  %v2038_v17 = vmov 0.0|0.0  }
 0x7ee   :  { %v1048_v28 = vrot.slane %v1047_v27, 1  ;;  %v1039_v29 = vrot.slane %v1038_v26, 2 }
 0x7f0   :  { %v1049_v31 = vadd.f32 %v1048_v28, %v1047_v27  ;;  %v1040_v32 = vadd.f32 %v1039_v29, %v1038_v26  ;;  %v1866_v26 = vpack.c.bf16 %v69_v25, %v68_v24  ;;  %v70_v27 = vld [vmem:[#allocation7 + $0x10] sm:$0xff]  ;;  %v71_v28 = vld [vmem:[#allocation7 + $0x18] sm:$0xff] }
 0x7f1   :  { %v1869_v29 = vpack.c.bf16 %v71_v28, %v70_v27 }
 0x7f2   :  { %v1051_v33 = vmul.f32 0.125, %v1049_v31  ;;  %v1041_v34 = vrot.slane %v1040_v32, 1 }
 0x7f4   :  { %1824 = vmatmul.mubr.msk.f32.vlgmr.msra.gmra.mrb[14].mxu1 %vm167_vm2, %v1051_v33  ;;  %v1042_v35 = vadd.f32 %v1041_v34, %v1040_v32 }
 0x7f5   :  { %1832 = vmatpush3.xpose.msk.msra.mxu1 %vm167_vm2, %v1285_v30  ;;  %1833 = vmatprep.mubr.msk.f32.mxu1 %vm2025_vm1, %v2024_v8 }
 0x7f6   :  { %v1050_v37 = vmul.f32 0.125, %v1042_v35  ;;  %1841 = vmatprep.subr.mxu1 %v2024_v8 }
 0x7f8   :  { %1819 = vmatmul.mubr.msk.f32.vlgmr.msra.gmra.mrb[8].mxu0 %vm167_vm2, %v1050_v37  ;;  %1834 = vmatmul.mubr.msk.f32.vlgmr.msra.gmra.mrb[16].mxu1 %vm167_vm2, %v1283_v38 }
 0x7f9   :  { %1827 = vmatpush3.xpose.msk.msra.mxu0 %vm167_vm2, %v1207_v36  ;;  %1828 = vmatprep.mubr.msk.f32.mxu0 %vm2025_vm1, %v2024_v8 }
 0x7fa   :  { %1836 = vmatprep.subr.mxu0 %v2024_v8  ;;  %1843 = vmatprep.mubr.msk.f32.mxu1 %vm2025_vm1, %v2024_v8 }
 0x7fc   :  { %1829 = vmatmul.mubr.msk.f32.vlgmr.msra.gmra.mrb[10].mxu0 %vm167_vm2, %v1205_v39 }
 0x7fd   :  { %1838 = vmatprep.mubr.msk.f32.mxu0 %vm2025_vm1, %v2024_v8 }
 0x8c7   :  { %v1200_v40 = vpop.f32.mrb[14].mxu1 }
 0x8c8   :  { %v1825_v41 = vpop.f32.mrb[15].mxu1 }
 0x8cb   :  { %v1124_v42 = vpop.f32.mrb[8].mxu0  ;;  %v1356_v43 = vpop.f32.mrb[16].mxu1 }
 0x8cc   :  { %v1820_v44 = vpop.f32.mrb[9].mxu0  ;;  %v1835_v45 = vpop.f32.mrb[17].mxu1  ;;  %v1363_v46 = vsel %vm167_vm2, %v1356_v43, -inf }
 0x8cd   :  { %1364 = vmax.xlane.f32.xlu0 %v1363_v46 }
 0x8cf   :  { %v1278_v47 = vpop.f32.mrb[10].mxu0 }
 0x8d0   :  { %v1830_v48 = vpop.f32.mrb[11].mxu0  ;;  %v1360_v49 = vsel %vm167_vm2, %v1278_v47, -inf }
 0x8d1   :  { %1361 = vmax.xlane.f32.xlu1 %v1360_v49 }
 0x8e2   :  { %1474 = vrot.lane.b32.xlu1 %v2137_v13, %s2036_s15 }
 0x8e6   :  { %1554 = vrot.lane.b32.xlu1 %v2225_v56, %s2022_s6 }
 0x8ea   :  { %1562 = vrot.lane.b32.xlu1 %v1200_v40, %s2037_s16 }
 0x95a   :  { %v1365_v50 = vpop.xlane.xlu0 %1364 }
 0x95b   :  { %v1367_v52 = vsub.f32 %v1356_v43, %v1365_v50 }
 0x95d   :  { %v1370_v53 = vmul.f32 1.442695, %v1367_v52 }
 0x95e   :  { %v1362_v54 = vpop.xlane.xlu1 %1361 }
 0x95f   :  { %1917 = vpow2.f32 %v1370_v53  ;;  %v1366_v55 = vsub.f32 %v1278_v47, %v1362_v54  ;;  %v1710_v47 = vld [vmem:[%s2296_s4] ss:$0 sm:$0xff] }
 0x961   :  { %v1368_v57 = vmul.f32 1.442695, %v1366_v55 }
 0x962   :  { %v1475_v58 = vpop.permute.xlu1 %1474 }
 0x963   :  { %1919 = vpow2.f32 %v1368_v57  ;;  %1842 = vmatpush3.msra.mxu1 %v1475_v58 }
 0x966   :  { %v1555_v34 = vpop.permute.xlu1 %1554 }
 0x967   :  { %v1575_v36 = vsel %vm167_vm2, %v2191_v3, %v1555_v34 }
 0x969   :  { %v1918_v59 = vpop.eup %1917 }
 0x96a   :  { %v1375_v60 = vsel %vm167_vm2, %v1918_v59, 0.0  ;;  %v1563_v35 = vpop.permute.xlu1 %1562 }
 0x96b   :  { %1376 = vadd.xlane.f32.xlu0 %v1375_v60  ;;  %v1578_v37 = vsel %vm1576_vm3, %v1575_v36, %v1563_v35 }
 0x96d   :  { %v1920_v13 = vpop.eup %1919 }
 0x96e   :  { %v1372_v61 = vsel %vm167_vm2, %v1920_v13, 0.0 }
 0x96f   :  { %1373 = vadd.xlane.f32.xlu0 %v1372_v61 }
 0x985   :  { %1398 = vrot.lane.b32.xlu0 %v2134_v12, %s2036_s15 }
 0x989   :  { %1552 = vrot.lane.b32.xlu0 %v2222_v51, %s2022_s6  ;;  %s2039_s6 = smov 24  }
 0x98d   :  { %1560 = vrot.lane.b32.xlu0 %v1124_v42, %s2037_s16 }
 0x9f8   :  { %v1377_v56 = vpop.xlane.xlu0 %1376 }
 0x9f9   :  { %1921 = vrcp.f32 %v1377_v56 }
 0x9fc   :  { %v1374_v62 = vpop.xlane.xlu0 %1373 }
 0x9fd   :  { %1923 = vrcp.f32 %v1374_v62 }
 0xa00   :  { %v1399_v63 = vpop.permute.xlu0 %1398 }
 0xa01   :  { %1837 = vmatpush3.msra.mxu0 %v1399_v63 }
 0xa02   :  { %1865 = vmatprep.subr.bf16.mxu0 %v2038_v17 }
 0xa03   :  { %v1922_v0 = vpop.eup %1921 }
 0xa04   :  { %v1381_v2 = vmul.f32 %v1922_v0, %v1918_v59 }
 0xa06   :  { %v1389_v4 = vsel %vm167_vm2, %v1381_v2, 0.0 }
 0xa07   :  { %v1924_v5 = vpop.eup %1923  ;;  %v1390_v6 = vrot.slane %v1389_v4, 4 }
 0xa08   :  { %v1380_v7 = vmul.f32 %v1924_v5, %v1920_v13 }
 0xa09   :  { %v1391_v9 = vadd.f32 %v1390_v6, %v1389_v4 }
 0xa0a   :  { %v1382_v12 = vsel %vm167_vm2, %v1380_v7, 0.0 }
 0xa0b   :  { %v1383_v10 = vrot.slane %v1382_v12, 4  ;;  %v1392_v15 = vrot.slane %v1391_v9, 2 }
 0xa0d   :  { %v1384_v51 = vadd.f32 %v1383_v10, %v1382_v12  ;;  %v1393_v11 = vadd.f32 %v1392_v15, %v1391_v9 }
 0xa0f   :  { %v1394_v14 = vrot.slane %v1393_v11, 1  ;;  %v1385_v16 = vrot.slane %v1384_v51, 2 }
 0xa11   :  { %v1395_v18 = vadd.f32 %v1394_v14, %v1393_v11  ;;  %v1386_v19 = vadd.f32 %v1385_v16, %v1384_v51 }
 0xa13   :  { %v1397_v20 = vmul.f32 0.125, %v1395_v18  ;;  %v1387_v21 = vrot.slane %v1386_v19, 1 }
 0xa15   :  { %1844 = vmatmul.mubr.msk.f32.vlgmr.msra.gmra.mrb[18].mxu1 %vm167_vm2, %v1397_v20  ;;  %v1388_v22 = vadd.f32 %v1387_v21, %v1386_v19 }
 0xa17   :  { %v1396_v23 = vmul.f32 0.125, %v1388_v22 }
 0xa19   :  { %1839 = vmatmul.mubr.msk.f32.vlgmr.msra.gmra.mrb[12].mxu0 %vm167_vm2, %v1396_v23 }
 0xa1a   :  { %1854 = vmatprep.mubr.msk.f32.mxu0 %vm2025_vm1, %v2024_v8  ;;  %1867 = vmatpush3.bf16.msra.mxu0 %v1866_v26  ;;  %v1553_v8 = vpop.permute.xlu0 %1552 }
 0xa1b   :  { %1868 = vmatprep.subr.bf16.mxu0 %v2038_v17  ;;  %v1574_v41 = vsel %vm167_vm2, %v2189_v1, %v1553_v8 }
 0xa1e   :  { %1870 = vmatpush3.bf16.msra.mxu0 %v1869_v29  ;;  %v1561_v39 = vpop.permute.xlu0 %1560 }
 0xa1f   :  { %v1577_v42 = vsel %vm1576_vm3, %v1574_v41, %v1561_v39 }
 0xae8   :  { %v1546_v30 = vpop.f32.mrb[18].mxu1 }
 0xae9   :  { %1570 = vrot.lane.b32.xlu1 %v1546_v30, %s2039_s6  ;;  %v1845_v31 = vpop.f32.mrb[19].mxu1 }
 0xaec   :  { %v1470_v32 = vpop.f32.mrb[12].mxu0 }
 0xaed   :  { %v1840_v33 = vpop.f32.mrb[13].mxu0  ;;  %1568 = vrot.lane.b32.xlu1 %v1470_v32, %s2039_s6 }
 0xb5b   :  { %v1571_v38 = vpop.permute.xlu1 %1570 }
 0xb5c   :  { %v1581_v40 = vsel %vm1579_vm4, %v1578_v37, %v1571_v38 }
 0xb5d   :  { %v1590_v43 = vrot.slane %v1581_v40, 7 }
 0xb5f   :  { %v1569_v44 = vpop.permute.xlu1 %1568 }
 0xb60   :  { %v1580_v45 = vsel %vm1579_vm4, %v1577_v42, %v1569_v44 }
 0xb61   :  { %v1592_v46 = vsel %vm1591_vm5, %v1590_v43, %v1580_v45 }
 0xb62   :  { %1855 = vmatmul.mubr.msk.f32.vlgmr.msra.gmra.mrb[14].mxu0 %vm80_vm0, %v1592_v46 }
 0xc35   :  { %v1661_v3 = vpop.f32.mrb[14].mxu0 }
 0xc36   :  { %v1662_v48 = vadd.f32 %v1710_v47, %v1661_v3  ;;  %v1856_v49 = vpop.f32.mrb[15].mxu0 }
 0xc38   :  { %1666 = vst.msk [vmem:[#allocation8] sm:$0x3] %vm1665_vm6, %v1662_v48 }
 0xc39   :  { %2002 = shalt.err (!%p1999_p0)
}
 0xc3a   :  { %s2003_s24 = scalar_lea.hbm %s2297_s5, 32 }
 0xc3b   :  { %p2004_p1 = scmp.ne.s32.totalorder %s2297_s5, %s2003_s24  ;;  %p2007_p2 = scmp.lt.u32.totalorder %s2003_s24, %s2297_s5 }
 0xc3d   :  { %p2009_p3 = pnand %p2007_p2, %p2004_p1 }
 0xc3f   :  { %2012 = shalt.err (!%p2009_p3)
}
 0xc40   :  { %1676 = dma.vmem_to_hbm [thread:$0]  %s1674_s19, 32, %s2297_s5, [#allocation4]  }
 0xc41   :  { %2017 = dma.done.wait [#allocation4], 32  }
 0xc42   :  { %2018 = vsyncadd [#allocation4], 4294967264 }
 0xc43   :  { %1680 = vsyncpa [#allocation3], 1 }
 0xc44   :  { %1681 = vsyncpa [#allocation6], 1 }
 0xc45   :  { %1682 = vsyncpa [#allocation4], 1 }

</bundles_post_ra>
